<compile_context>
chip_gen: v7x
topology: tpu7x:2x2x1
jax: 0.10.0
libtpu: 0.0.40
codegen_flags: <defaults>
</compile_context>

<pallas_src>
import functools

import jax
import jax.numpy as jnp
from jax.experimental import pallas as pl
from jax.experimental.pallas import tpu as pltpu


# ------------------------------ tiling helper ------------------------------

_PER_BLOCK_BUDGET = 2 * 1024 * 1024     # bytes per (C, hw_tile) block
_VMEM_LIMIT = 32 * 1024 * 1024          # explicit scoped-VMEM request


def _choose_hw_tile(hw, c, dtype_bytes):
    """HW tile on the lane axis: full HW, or a multiple of 128 dividing HW,
    small enough that in+out double-buffered blocks fit comfortably in VMEM."""
    max_elems = max(128, _PER_BLOCK_BUDGET // (dtype_bytes * max(c, 1)))
    if hw <= max_elems:
        return hw
    t = (max_elems // 128) * 128
    while t >= 128:
        if hw % t == 0:
            return t
        t -= 128
    # No lane-aligned divisor found: fall back to the whole plane (exempt from
    # the (8,128) rule because it equals the full array dim).
    return hw


# ------------------------------ kernels ------------------------------------


def _pool_kernel(x_ref, mean_ref, acc_ref, *, inv_hw):
    # x_ref: (1, C, hw_tile)   mean_ref: (1, C, 1) f32   acc_ref: (C, 1) f32
    k = pl.program_id(1)

    @pl.when(k == 0)
    def _():
        acc_ref[...] = jnp.zeros_like(acc_ref)

    # Partial sum over the lane (spatial) axis; accumulate in f32 without
    # keeping a full-tile f32 copy alive.
    acc_ref[...] += jnp.sum(x_ref[0], axis=-1, keepdims=True,
                            dtype=jnp.float32)          # (C, 1)

    @pl.when(k == pl.num_programs(1) - 1)
    def _():
        mean_ref[0] = acc_ref[...] * inv_hw


def _gate_kernel(p_ref, w1t_ref, w2t_ref, g_ref):
    # p_ref: (B, C) f32 pooled means; w1t: (C, C_red); w2t: (C_red, C)
    # One batched matmul for all B (instead of per-batch N=1 matmuls).
    p = p_ref[...]                                                   # (B, C)
    h = jnp.dot(p, w1t_ref[...].astype(jnp.float32),
                preferred_element_type=jnp.float32)                  # (B, C_red)
    h = jnp.maximum(h, 0.0)
    g = jnp.dot(h, w2t_ref[...].astype(jnp.float32),
                preferred_element_type=jnp.float32)                  # (B, C)
    g_ref[...] = jax.nn.sigmoid(g)


def _scale_kernel(x_ref, g_ref, o_ref):
    # x_ref/o_ref: (1, C, hw_tile) native dtype; g_ref: (1, C, 1) f32
    # Keep the broadcast multiply in the input dtype (no f32 tile copy).
    g = g_ref[0].astype(o_ref.dtype)                                 # (C, 1)
    o_ref[0] = x_ref[0] * g


# ------------------------------ wrapper -------------------------------------


def se_layer(x, w1, w2):
    """x: (B, C, H, W); w1: (C//r, C); w2: (C, C//r). Matches SELayer.forward."""
    B, C, H, W = x.shape
    HW = H * W
    C_red = w1.shape[0]
    dtype_bytes = jnp.dtype(x.dtype).itemsize
    hw_tile = _choose_hw_tile(HW, C, dtype_bytes)
    n_hw = HW // hw_tile

    x_flat = x.reshape(B, C, HW)

    # ---------- Phase 1: global average pool -> (B, C, 1) f32 ----------
    pooled3 = pl.pallas_call(
        functools.partial(_pool_kernel, inv_hw=1.0 / HW),
        out_shape=jax.ShapeDtypeStruct((B, C, 1), jnp.float32),
        grid_spec=pltpu.PrefetchScalarGridSpec(
            num_scalar_prefetch=0,
            grid=(B, n_hw),
            in_specs=[pl.BlockSpec((1, C, hw_tile), lambda b, k: (b, 0, k))],
            out_specs=pl.BlockSpec((1, C, 1), lambda b, k: (b, 0, 0)),
            scratch_shapes=[pltpu.VMEM((C, 1), jnp.float32)],
        ),
        compiler_params=pltpu.CompilerParams(
            dimension_semantics=("parallel", "arbitrary"),
            vmem_limit_bytes=_VMEM_LIMIT),
        cost_estimate=pl.CostEstimate(
            flops=B * C * HW,
            transcendentals=0,
            bytes_accessed=B * C * HW * dtype_bytes + B * C * 4),
    )(x_flat)

    # ---------- Phase 2: excitation gates for all batches at once ----------
    pooled = pooled3[:, :, 0]                       # (B, C) f32, tiny reshape
    gates = pl.pallas_call(
        _gate_kernel,
        out_shape=jax.ShapeDtypeStruct((B, C), jnp.float32),
        cost_estimate=pl.CostEstimate(
            flops=4 * B * C * C_red,
            transcendentals=B * C,
            bytes_accessed=(2 * B * C + 2 * C * C_red) * 4),
    )(pooled, jnp.transpose(w1), jnp.transpose(w2))
    gates3 = gates[:, :, None]                      # (B, C, 1) f32

    # ---------- Phase 3: channel-wise scale (native dtype) ----------
    out_flat = pl.pallas_call(
        _scale_kernel,
        out_shape=jax.ShapeDtypeStruct((B, C, HW), x.dtype),
        grid_spec=pltpu.PrefetchScalarGridSpec(
            num_scalar_prefetch=0,
            grid=(B, n_hw),
            in_specs=[
                pl.BlockSpec((1, C, hw_tile), lambda b, k: (b, 0, k)),
                pl.BlockSpec((1, C, 1), lambda b, k: (b, 0, 0)),
            ],
            out_specs=pl.BlockSpec((1, C, hw_tile), lambda b, k: (b, 0, k)),
        ),
        compiler_params=pltpu.CompilerParams(
            dimension_semantics=("parallel", "parallel"),
            vmem_limit_bytes=_VMEM_LIMIT),
        cost_estimate=pl.CostEstimate(
            flops=B * C * HW,
            transcendentals=0,
            bytes_accessed=2 * B * C * HW * dtype_bytes + B * C * 4),
    )(x_flat, gates3)

    return out_flat.reshape(B, C, H, W)


def se_layer_ref(x, w1, w2):
    """Pure-JAX reference matching the PyTorch SELayer forward."""
    y = jnp.mean(x, axis=(2, 3))                 # adaptive avg pool to 1x1
    y = jnp.maximum(y @ w1.T, 0.0)               # Linear(C, C//r, bias=False) + ReLU
    y = jax.nn.sigmoid(y @ w2.T)                 # Linear(C//r, C, bias=False) + Sigmoid
    return x * y[:, :, None, None]               # torch.mul(x, y)


if __name__ == "__main__":
    # Small shapes consistent with the module: channel=32, reduction=16 -> hidden=2
    B, C, H, W = 2, 32, 16, 16
    reduction = 16
    C_red = C // reduction

    key = jax.random.PRNGKey(0)
    kx, k1, k2 = jax.random.split(key, 3)

    x = jax.random.normal(kx, (B, C, H, W), dtype=jnp.float32)
    # nn.Linear weights are (out_features, in_features).
    w1 = jax.random.normal(k1, (C_red, C), dtype=jnp.float32) * 0.1
    w2 = jax.random.normal(k2, (C, C_red), dtype=jnp.float32) * 0.1

    out = jax.block_until_ready(jax.jit(se_layer)(x, w1, w2))
    ref = jax.block_until_ready(se_layer_ref(x, w1, w2))

    assert out.shape == (B, C, H, W)
    assert jnp.allclose(out, ref, atol=1e-5, rtol=1e-5)
    print("KERNEL_OK")
</pallas_src>

<mosaic_0001>
module attributes {stable_mosaic.version = 11 : i64} {
  func.func @_pool_kernel(%arg0: i32, %arg1: i32, %arg2: memref<1x32x256xf32, #tpu.memory_space<vmem>>, %arg3: memref<1x32x1xf32, #tpu.memory_space<vmem>>, %arg4: memref<32x1xf32, #tpu.memory_space<vmem>>) attributes {dimension_semantics = [#tpu.dimension_semantics<parallel>, #tpu.dimension_semantics<arbitrary>], iteration_bounds = array<i64: 2, 1>, scalar_prefetch = 0 : i64, scratch_operands = 1 : i64, tpu.core_type = #tpu.core_type<tc>, window_params = [{transform_indices = @transform_0, window_bounds = array<i64: 1, 32, 256>}, {transform_indices = @transform_1, window_bounds = array<i64: 1, 32, 1>}]} {
    %c0_i32 = arith.constant 0 : i32
    %0 = arith.cmpi eq, %arg1, %c0_i32 : i32
    %1 = arith.extui %0 : i1 to i32
    %c0_i32_0 = arith.constant 0 : i32
    %2 = arith.cmpi ne, %1, %c0_i32_0 : i32
    scf.if %2 {
      %cst_9 = arith.constant 0.000000e+00 : f32
      %13 = vector.broadcast %cst_9 : f32 to vector<32x1xf32>
      %c0_10 = arith.constant 0 : index
      %c0_11 = arith.constant 0 : index
      %14 = vector.load %arg4[%c0_10, %c0_11] : memref<32x1xf32, #tpu.memory_space<vmem>>, vector<32x1xf32>
      tpu.vector_store %arg4[%c0_10, %c0_11], %13 {strides = array<i32>} : memref<32x1xf32, #tpu.memory_space<vmem>>, vector<32x1xf32>,
    } else {
    }
    %c0 = arith.constant 0 : index
    %c0_1 = arith.constant 0 : index
    %3 = vector.load %arg4[%c0, %c0_1] : memref<32x1xf32, #tpu.memory_space<vmem>>, vector<32x1xf32>
    %c0_2 = arith.constant 0 : index
    %c0_3 = arith.constant 0 : index
    %c0_4 = arith.constant 0 : index
    %4 = vector.load %arg2[%c0_2, %c0_3, %c0_4] : memref<1x32x256xf32, #tpu.memory_space<vmem>>, vector<1x32x256xf32>
    %5 = vector.shape_cast %4 : vector<1x32x256xf32> to vector<32x256xf32>
    %cst = arith.constant dense<0.000000e+00> : vector<32xf32>
    %6 = vector.multi_reduction <add>, %5, %cst [1] : vector<32x256xf32> to vector<32xf32>
    %7 = vector.shape_cast %6 : vector<32xf32> to vector<32x1xf32>
    %8 = arith.addf %3, %7 : vector<32x1xf32>
    %c0_5 = arith.constant 0 : index
    %c0_6 = arith.constant 0 : index
    %9 = vector.load %arg4[%c0_5, %c0_6] : memref<32x1xf32, #tpu.memory_space<vmem>>, vector<32x1xf32>
    tpu.vector_store %arg4[%c0_5, %c0_6], %8 {strides = array<i32>} : memref<32x1xf32, #tpu.memory_space<vmem>>, vector<32x1xf32>,
    %c0_i32_7 = arith.constant 0 : i32
    %10 = arith.cmpi eq, %arg1, %c0_i32_7 : i32
    %11 = arith.extui %10 : i1 to i32
    %c0_i32_8 = arith.constant 0 : i32
    %12 = arith.cmpi ne, %11, %c0_i32_8 : i32
    scf.if %12 {
      %c0_9 = arith.constant 0 : index
      %c0_10 = arith.constant 0 : index
      %13 = vector.load %arg4[%c0_9, %c0_10] : memref<32x1xf32, #tpu.memory_space<vmem>>, vector<32x1xf32>
      %cst_11 = arith.constant 3.906250e-03 : f32
      %14 = vector.broadcast %cst_11 : f32 to vector<32x1xf32>
      %15 = arith.mulf %13, %14 : vector<32x1xf32>
      %c0_12 = arith.constant 0 : index
      %c0_13 = arith.constant 0 : index
      %c0_14 = arith.constant 0 : index
      %16 = vector.load %arg3[%c0_12, %c0_13, %c0_14] : memref<1x32x1xf32, #tpu.memory_space<vmem>>, vector<1x32x1xf32>
      %17 = vector.shape_cast %16 : vector<1x32x1xf32> to vector<32x1xf32>
      %18 = vector.shape_cast %15 : vector<32x1xf32> to vector<1x32x1xf32>
      tpu.vector_store %arg3[%c0_12, %c0_13, %c0_14], %18 {strides = array<i32>} : memref<1x32x1xf32, #tpu.memory_space<vmem>>, vector<1x32x1xf32>,
    } else {
    }
    return
  }
  func.func @transform_0(%arg0: i32, %arg1: i32) -> (i32, i32, i32) {
    %c0_i32 = arith.constant 0 : i32
    %c0_i32_0 = arith.constant 0 : i32
    return %arg0, %c0_i32, %arg1 : i32, i32, i32
  }
  func.func @transform_1(%arg0: i32, %arg1: i32) -> (i32, i32, i32) {
    %c0_i32 = arith.constant 0 : i32
    %c0_i32_0 = arith.constant 0 : i32
    %c0_i32_1 = arith.constant 0 : i32
    return %arg0, %c0_i32, %c0_i32_0 : i32, i32, i32
  }
}

module attributes {stable_mosaic.version = 11 : i64} {
  func.func @_scale_kernel(%arg0: i32, %arg1: i32, %arg2: memref<1x32x256xf32, #tpu.memory_space<vmem>>, %arg3: memref<1x32x1xf32, #tpu.memory_space<vmem>>, %arg4: memref<1x32x256xf32, #tpu.memory_space<vmem>>) attributes {dimension_semantics = [#tpu.dimension_semantics<parallel>, #tpu.dimension_semantics<parallel>], iteration_bounds = array<i64: 2, 1>, scalar_prefetch = 0 : i64, scratch_operands = 0 : i64, tpu.core_type = #tpu.core_type<tc>, window_params = [{transform_indices = @transform_0, window_bounds = array<i64: 1, 32, 256>}, {transform_indices = @transform_1, window_bounds = array<i64: 1, 32, 1>}, {transform_indices = @transform_2, window_bounds = array<i64: 1, 32, 256>}]} {
    %c0 = arith.constant 0 : index
    %c0_0 = arith.constant 0 : index
    %c0_1 = arith.constant 0 : index
    %0 = vector.load %arg3[%c0, %c0_0, %c0_1] : memref<1x32x1xf32, #tpu.memory_space<vmem>>, vector<1x32x1xf32>
    %1 = vector.shape_cast %0 : vector<1x32x1xf32> to vector<32x1xf32>
    %c0_2 = arith.constant 0 : index
    %c0_3 = arith.constant 0 : index
    %c0_4 = arith.constant 0 : index
    %2 = vector.load %arg2[%c0_2, %c0_3, %c0_4] : memref<1x32x256xf32, #tpu.memory_space<vmem>>, vector<1x32x256xf32>
    %3 = vector.shape_cast %2 : vector<1x32x256xf32> to vector<32x256xf32>
    %4 = vector.broadcast %1 : vector<32x1xf32> to vector<32x256xf32>
    %5 = arith.mulf %3, %4 : vector<32x256xf32>
    %c0_5 = arith.constant 0 : index
    %c0_6 = arith.constant 0 : index
    %c0_7 = arith.constant 0 : index
    %6 = vector.load %arg4[%c0_5, %c0_6, %c0_7] : memref<1x32x256xf32, #tpu.memory_space<vmem>>, vector<1x32x256xf32>
    %7 = vector.shape_cast %6 : vector<1x32x256xf32> to vector<32x256xf32>
    %8 = vector.shape_cast %5 : vector<32x256xf32> to vector<1x32x256xf32>
    tpu.vector_store %arg4[%c0_5, %c0_6, %c0_7], %8 {strides = array<i32>} : memref<1x32x256xf32, #tpu.memory_space<vmem>>, vector<1x32x256xf32>,
    return
  }
  func.func @transform_0(%arg0: i32, %arg1: i32) -> (i32, i32, i32) {
    %c0_i32 = arith.constant 0 : i32
    %c0_i32_0 = arith.constant 0 : i32
    return %arg0, %c0_i32, %arg1 : i32, i32, i32
  }
  func.func @transform_1(%arg0: i32, %arg1: i32) -> (i32, i32, i32) {
    %c0_i32 = arith.constant 0 : i32
    %c0_i32_0 = arith.constant 0 : i32
    %c0_i32_1 = arith.constant 0 : i32
    return %arg0, %c0_i32, %c0_i32_0 : i32, i32, i32
  }
  func.func @transform_2(%arg0: i32, %arg1: i32) -> (i32, i32, i32) {
    %c0_i32 = arith.constant 0 : i32
    %c0_i32_0 = arith.constant 0 : i32
    return %arg0, %c0_i32, %arg1 : i32, i32, i32
  }
}

module attributes {stable_mosaic.version = 11 : i64} {
  func.func @_gate_kernel(%arg0: memref<2x32xf32, #tpu.memory_space<vmem>>, %arg1: memref<32x2xf32, #tpu.memory_space<vmem>>, %arg2: memref<2x32xf32, #tpu.memory_space<vmem>>, %arg3: memref<2x32xf32, #tpu.memory_space<vmem>>) attributes {dimension_semantics = [], scalar_prefetch = 0 : i64, scratch_operands = 0 : i64, tpu.core_type = #tpu.core_type<tc>} {
    %c0 = arith.constant 0 : index
    %c0_0 = arith.constant 0 : index
    %0 = vector.load %arg0[%c0, %c0_0] : memref<2x32xf32, #tpu.memory_space<vmem>>, vector<2x32xf32>
    %c0_1 = arith.constant 0 : index
    %c0_2 = arith.constant 0 : index
    %1 = vector.load %arg1[%c0_1, %c0_2] : memref<32x2xf32, #tpu.memory_space<vmem>>, vector<32x2xf32>
    %cst = arith.constant dense<0.000000e+00> : vector<2x2xf32>
    %2 = tpu.matmul %0, %1, %cst {dimension_numbers = #tpu.dot_dimension_numbers<[1], [0], [0], [1], [0, 0, 1, 1], [], []>} : vector<2x32xf32>, vector<32x2xf32>, vector<2x2xf32> -> vector<2x2xf32>
    %cst_3 = arith.constant 0.000000e+00 : f32
    %3 = vector.broadcast %cst_3 : f32 to vector<2x2xf32>
    %4 = arith.maximumf %2, %3 : vector<2x2xf32>
    %c0_4 = arith.constant 0 : index
    %c0_5 = arith.constant 0 : index
    %5 = vector.load %arg2[%c0_4, %c0_5] : memref<2x32xf32, #tpu.memory_space<vmem>>, vector<2x32xf32>
    %cst_6 = arith.constant dense<0.000000e+00> : vector<2x32xf32>
    %6 = tpu.matmul %4, %5, %cst_6 {dimension_numbers = #tpu.dot_dimension_numbers<[1], [0], [0], [1], [0, 0, 1, 1], [], []>} : vector<2x2xf32>, vector<2x32xf32>, vector<2x32xf32> -> vector<2x32xf32>
    %7 = arith.negf %6 : vector<2x32xf32>
    %8 = math.exp %7 : vector<2x32xf32>
    %cst_7 = arith.constant 1.000000e+00 : f32
    %9 = vector.broadcast %cst_7 : f32 to vector<2x32xf32>
    %10 = arith.addf %9, %8 : vector<2x32xf32>
    %11 = arith.divf %9, %10 : vector<2x32xf32>
    %c0_8 = arith.constant 0 : index
    %c0_9 = arith.constant 0 : index
    %12 = vector.load %arg3[%c0_8, %c0_9] : memref<2x32xf32, #tpu.memory_space<vmem>>, vector<2x32xf32>
    tpu.vector_store %arg3[%c0_8, %c0_9], %11 {strides = array<i32>} : memref<2x32xf32, #tpu.memory_space<vmem>>, vector<2x32xf32>,
    return
  }
}

</mosaic_0001>

<bundles_post_ra>
// kernel: se_layer.5
= control target key start
LH: loop header
LB: loop body
LE: loop exit
PB: predicated region body
PF: predicated region fallthrough
CT: control target
= control target key end

     0   :  { %s433_s9 = smov 0   ;;  %s435_s10 = smov 0   ;;  %s469_s0 = inlined_call_operand.vmem [shape: f32[2,32,256], index: 0, kind: input, shape index: {}]   ;;  %s470_s1 = inlined_call_operand.vmem [shape: f32[2,32,1], index: 1, kind: input, shape index: {}]   ;;  %s471_s2 = inlined_call_operand.vmem [shape: f32[2,32,256], index: 2, kind: output, shape index: {}]  }
   0x1   :  { %s437_s11 = smov 0  }
   0x2 LB: > { %s24_s12 = sadd.s32 1, %s411_s10  ;;  %p354_p0 = scmp.ge.s32.totalorder %s415_s11, 1  ;;  %s415_s11 = sphi %s437_s11, %s12_s11   ;;  %s411_s10 = sphi %s435_s10, %s473_s10   ;;  %s407_s9 = sphi %s433_s9, %s472_s9  }
   0x3   : > { %p26_p1 = scmp.ge.s32.totalorder %s24_s12, 2  ;;  %p143_p2 = scmp.lt.s32.totalorder %s415_s11, 3 }
   0x5   : > { %s475_s12 = smov (%p26_p1, %s24_s12), 0  ;;  %p144_p3 = pnand %p354_p0, %p143_p2 }
   0x6   : > { %p179_p4 = scmp.lt.s32.totalorder (!%p144_p3), %s407_s9, 1  ;;  %v417_v0 = vmov (!%p144_p3), 0  }
   0x7   : > { %147 = sbr.rel (%p144_p3) target bundleno = 154 (0x9a), region = 28  ;;  %392 = vset.pattern.permute.xlu1 (!%p144_p3), %v417_v0  ;;  %391 = vset.pattern.permute.xlu0 (!%p144_p3), %v417_v0 }
   0xe   : > { %s477_s9 = smov (!%p179_p4, %s407_s9), 1 }
   0xf   : > { %s364_s13 = sshll.u32 %s477_s9, 5  ;;  %s363_s17 = sshll.u32 %s477_s9, 6 }
  0x10   : > { %s192_s16 = scalar_lea.vmem %s470_s1, %s364_s13  ;;  %s186_s20 = scalar_lea.vmem %s469_s0, %s363_s17 }
  0x11   : > { %v205_v1 = vld [vmem:[%s192_s16 + $0x10] sm:$0xff]  ;;  %v203_v2 = vld [vmem:[%s192_s16] sm:$0xff]  ;;  %v206_v3 = vld [vmem:[%s192_s16 + $0x18] sm:$0xff]  ;;  %s201_s23 = scalar_lea.vmem %s471_s2, %s363_s17 }
  0x12   : > { %227 = vperm.xlu1 %392, %v205_v1   ;;  %217 = vperm.xlu0 %391, %v203_v2   ;;  %v204_v4 = vld [vmem:[%s192_s16 + $0x8] sm:$0xff]  ;;  %v211_v5 = vld [vmem:[%s186_s20 + $0x20] sm:$0xff]  ;;  %v213_v15 = vld [vmem:[%s186_s20 + $0x30] sm:$0xff] }
  0x13   : > { %v212_v6 = vld [vmem:[%s186_s20 + $0x28] sm:$0xff]  ;;  %v207_v7 = vld [vmem:[%s186_s20] sm:$0xff]  ;;  %v214_v16 = vld [vmem:[%s186_s20 + $0x38] sm:$0xff] }
  0x14   : > { %v208_v8 = vld [vmem:[%s186_s20 + $0x8] sm:$0xff]  ;;  %v209_v17 = vld [vmem:[%s186_s20 + $0x10] sm:$0xff]  ;;  %v210_v18 = vld [vmem:[%s186_s20 + $0x18] sm:$0xff] }
  0x16   : > { %232 = vperm.xlu1 %392, %v206_v3   ;;  %222 = vperm.xlu0 %391, %v204_v4  }
  0x91   : > { %v228_v9 = vpop.permute.xlu1 %227  ;;  %v218_v10 = vpop.permute.xlu0 %217 }
  0x92   : > { %v239_v11 = vmul.f32 %v228_v9, %v211_v5  ;;  %v240_v12 = vmul.f32 %v228_v9, %v212_v6  ;;  %v235_v13 = vmul.f32 %v218_v10, %v207_v7  ;;  %v236_v14 = vmul.f32 %v218_v10, %v208_v8 }
  0x94   : > { %247 = vst [vmem:[%s201_s23 + $0x20] sm:$0xff] %v239_v11  ;;  %248 = vst [vmem:[%s201_s23 + $0x28] sm:$0xff] %v240_v12 }
  0x95   : > { %243 = vst [vmem:[%s201_s23] sm:$0xff] %v235_v13  ;;  %244 = vst [vmem:[%s201_s23 + $0x8] sm:$0xff] %v236_v14  ;;  %v233_v19 = vpop.permute.xlu1 %232  ;;  %v223_v20 = vpop.permute.xlu0 %222 }
  0x96   : > { %v241_v21 = vmul.f32 %v233_v19, %v213_v15  ;;  %v242_v22 = vmul.f32 %v233_v19, %v214_v16  ;;  %v237_v23 = vmul.f32 %v223_v20, %v209_v17  ;;  %v238_v24 = vmul.f32 %v223_v20, %v210_v18 }
  0x98   : > { %249 = vst [vmem:[%s201_s23 + $0x30] sm:$0xff] %v241_v21  ;;  %250 = vst [vmem:[%s201_s23 + $0x38] sm:$0xff] %v242_v22 }
  0x99   : > { %245 = vst [vmem:[%s201_s23 + $0x10] sm:$0xff] %v237_v23  ;;  %246 = vst [vmem:[%s201_s23 + $0x18] sm:$0xff] %v238_v24 }
  0x9a PF: > { %s12_s11 = sadd.s32 1, %s415_s11   ;;  %s472_s9 = smov %s411_s10 }
  0x9b   : > { %p9_p5 = scmp.ge.s32.totalorder %s12_s11, 4   ;;  %s473_s10 = smov %s475_s12 }
  0x9d   :  { %11 = sbr.rel (!%p9_p5) target bundleno = 2 (0x2), region = 61 }

// kernel: se_layer.4
= control target key start
LH: loop header
LB: loop body
LE: loop exit
PB: predicated region body
PF: predicated region fallthrough
CT: control target
= control target key end

     0   :  { %v225_v0 = vmov 0.0|0.0   ;;  %vm226_vm0 = vmmov 0   ;;  %v227_v4 = vmov 0.0   ;;  %vm19_vm1 = vcmask 261120   ;;  %s269_s1 = inlined_call_operand.vmem [shape: f32[32,2], index: 1, kind: input, shape index: {}]   ;;  %s270_s0 = inlined_call_operand.vmem [shape: f32[2,32], index: 0, kind: input, shape index: {}]   ;;  %s271_s2 = inlined_call_operand.vmem [shape: f32[2,32], index: 2, kind: input, shape index: {}]   ;;  %s272_s3 = inlined_call_operand.vmem [shape: f32[2,32], index: 3, kind: output, shape index: {}]  }
   0x1   :  { %212 = vmatprep.subr.bf16.mxu0 %v225_v0  ;;  %v15_v1 = vld [vmem:[%s269_s1] sm:$0xff]  ;;  %v16_v2 = vld [vmem:[%s269_s1 + $0x8] sm:$0xff]  ;;  %v17_v3 = vld [vmem:[%s269_s1 + $0x10] sm:$0xff]  ;;  %204 = vmatprep.mubr.msk.f32.mxu0 %vm226_vm0, %v227_v4  ;;  %vm99_vm2 = vcmask 1041408   ;;  %vm95_vm3 = vcmask 15360   ;;  %vm179_vm4 = vcmask 254976  }
   0x2   :  { %v213_v5 = vpack.c.bf16 %v16_v2, %v15_v1  ;;  %v18_v6 = vld [vmem:[%s269_s1 + $0x18] sm:$0xff]  ;;  %207 = vmatprep.subr.mxu1 %v227_v4  ;;  %209 = vmatprep.mubr.msk.f32.mxu1 %vm226_vm0, %v227_v4  ;;  %v14_v8 = vld [vmem:[%s270_s0] sm:$0x3] }
   0x3   :  { %v216_v7 = vpack.c.bf16 %v18_v6, %v17_v3  ;;  %v94_v9 = vld [vmem:[%s271_s2] sm:$0x3] }
   0x4   :  { %214 = vmatpush3.bf16.msra.mxu0 %v213_v5  ;;  %208 = vmatpush3.msk.msra.mxu1 %vm99_vm2, %v94_v9 }
   0x5   :  { %215 = vmatprep.subr.bf16.mxu0 %v225_v0 }
   0x8   :  { %217 = vmatpush3.bf16.msra.mxu0 %v216_v7 }
   0xb   :  { %205 = vmatmul.mubr.msk.f32.vlgmr.msra.gmra.mrb[0].mxu0 %vm19_vm1, %v14_v8 }
  0xde   :  { %v89_v10 = vpop.f32.mrb[0].mxu0 }
  0xdf   :  { %v93_v11 = vmax.f32 %v89_v10, 0.0  ;;  %v206_v12 = vpop.f32.mrb[1].mxu0 }
  0xe1   :  { %210 = vmatmul.mubr.msk.f32.vlgmr.msra.gmra.mrb[0].mxu1 %vm95_vm3, %v93_v11 }
 0x1b4   :  { %v169_v13 = vpop.f32.mrb[0].mxu1 }
 0x1b5   :  { %v188_v14 = vmul.f32 -1.442695, %v169_v13  ;;  %v211_v15 = vpop.f32.mrb[1].mxu1 }
 0x1b7   :  { %221 = vpow2.f32 %v188_v14 }
 0x1c1   :  { %v222_v16 = vpop.eup %221 }
 0x1c2   :  { %v176_v17 = vadd.f32 1.0, %v222_v16 }
 0x1c4   :  { %223 = vrcp.f32 %v176_v17 }
 0x1ce   :  { %v224_v18 = vpop.eup %223 }
 0x1cf   :  { %180 = vst.msk [vmem:[%s272_s3] sm:$0x3] %vm179_vm4, %v224_v18 }

// kernel: se_layer.3
= control target key start
LH: loop header
LB: loop body
LE: loop exit
PB: predicated region body
PF: predicated region fallthrough
CT: control target
= control target key end

     0   :  { %s344_s6 = smov 0   ;;  %s346_s7 = smov 0   ;;  %s393_s0 = inlined_call_operand.vmem [shape: f32[2,32,256], index: 0, kind: input, shape index: {}]   ;;  %s394_s1 = inlined_call_operand.vmem [shape: f32[2,32,1], index: 1, kind: output, shape index: {}]  }
   0x1   :  { %s348_s8 = smov 0  }
   0x2 LB: > { %s23_s9 = sadd.s32 1, %s327_s7  ;;  %p275_p0 = scmp.ge.s32.totalorder %s331_s8, 1  ;;  %s331_s8 = sphi %s348_s8, %s11_s8   ;;  %s327_s7 = sphi %s346_s7, %s396_s7   ;;  %s323_s6 = sphi %s344_s6, %s395_s6  }
   0x3   : > { %p25_p1 = scmp.ge.s32.totalorder %s23_s9, 2  ;;  %p106_p2 = scmp.lt.s32.totalorder %s331_s8, 3 }
   0x5   : > { %s398_s9 = smov (%p25_p1, %s23_s9), 0  ;;  %p107_p3 = pnand %p275_p0, %p106_p2 }
   0x6   : > { %p131_p4 = scmp.lt.s32.totalorder (!%p107_p3), %s323_s6, 1  ;;  %vm149_vm0 = vcmask (!%p107_p3), 7168   ;;  %v333_v0 = vmov (!%p107_p3), 0.0  }
   0x7   : > { %110 = sbr.rel (%p107_p3) target bundleno = 180 (0xb4), region = 24  ;;  %152 = vst.msk [vmem:[#allocation2 + $0x10] sm:$0xff] (!%p107_p3), %vm149_vm0, %v333_v0  ;;  %150 = vst.msk [vmem:[#allocation2] sm:$0xff] (!%p107_p3), %vm149_vm0, %v333_v0 }
   0x8   : > { %151 = vst.msk [vmem:[#allocation2 + $0x8] sm:$0xff] (!%p107_p3), %vm149_vm0, %v333_v0  ;;  %153 = vst.msk [vmem:[#allocation2 + $0x18] sm:$0xff] (!%p107_p3), %vm149_vm0, %v333_v0 }
   0xe   : > { %s400_s6 = smov (!%p131_p4, %s323_s6), 1  ;;  %v156_v13 = vld [vmem:[#allocation2 + $0x10] sm:$0xff]  ;;  %v154_v14 = vld [vmem:[#allocation2] sm:$0xff] }
   0xf   : > { %s282_s10 = sshll.u32 %s400_s6, 6  ;;  %v157_v19 = vld [vmem:[#allocation2 + $0x18] sm:$0xff]  ;;  %v155_v20 = vld [vmem:[#allocation2 + $0x8] sm:$0xff]  ;;  %s283_s14 = sshll.u32 %s400_s6, 5 }
  0x10   : > { %s138_s13 = scalar_lea.vmem %s393_s0, %s282_s10  ;;  %s144_s17 = scalar_lea.vmem %s394_s1, %s283_s14 }
  0x11   : > { %v162_v1 = vld [vmem:[%s138_s13 + $0x20] sm:$0xff]  ;;  %v163_v2 = vld [vmem:[%s138_s13 + $0x28] sm:$0xff]  ;;  %v164_v6 = vld [vmem:[%s138_s13 + $0x30] sm:$0xff] }
  0x12   : > { %v158_v3 = vld [vmem:[%s138_s13] sm:$0xff]  ;;  %v172_v4 = vadd.f32 %v163_v2, %v162_v1  ;;  %v159_v5 = vld [vmem:[%s138_s13 + $0x8] sm:$0xff]  ;;  %v165_v7 = vld [vmem:[%s138_s13 + $0x38] sm:$0xff] }
  0x13   : > { %v166_v8 = vadd.f32 %v159_v5, %v158_v3  ;;  %v160_v9 = vld [vmem:[%s138_s13 + $0x10] sm:$0xff]  ;;  %v161_v10 = vld [vmem:[%s138_s13 + $0x18] sm:$0xff]  ;;  %v175_v11 = vadd.f32 %v165_v7, %v164_v6 }
  0x14   : > { %173 = vadd.xlane.f32.xlu1 %v172_v4  ;;  %v169_v12 = vadd.f32 %v161_v10, %v160_v9 }
  0x15   : > { %167 = vadd.xlane.f32.xlu0 %v166_v8 }
  0x18   : > { %176 = vadd.xlane.f32.xlu1 %v175_v11 }
  0x19   : > { %170 = vadd.xlane.f32.xlu0 %v169_v12 }
  0xa1   : > { %v174_v15 = vpop.xlane.xlu1 %173 }
  0xa2   : > { %v180_v16 = vadd.f32 %v174_v15, %v156_v13  ;;  %v168_v17 = vpop.xlane.xlu0 %167 }
  0xa3   : > { %v178_v18 = vadd.f32 %v168_v17, %v154_v14 }
  0xa4   : > { %185 = vst.msk [vmem:[#allocation2 + $0x10] sm:$0xff] %vm149_vm0, %v180_v16 }
  0xa5   : > { %183 = vst.msk [vmem:[#allocation2] sm:$0xff] %vm149_vm0, %v178_v18  ;;  %v177_v21 = vpop.xlane.xlu1 %176 }
  0xa6   : > { %v181_v22 = vadd.f32 %v177_v21, %v157_v19  ;;  %v171_v23 = vpop.xlane.xlu0 %170 }
  0xa7   : > { %v179_v24 = vadd.f32 %v171_v23, %v155_v20 }
  0xa8   : > { %186 = vst.msk [vmem:[#allocation2 + $0x18] sm:$0xff] %vm149_vm0, %v181_v22 }
  0xa9   : > { %184 = vst.msk [vmem:[#allocation2 + $0x8] sm:$0xff] %vm149_vm0, %v179_v24 }
  0xab   : > { %v192_v25 = vld [vmem:[#allocation2 + $0x10] sm:$0xff] }
  0xac   : > { %v196_v26 = vmul.f32 0.00390625, %v192_v25  ;;  %v190_v27 = vld [vmem:[#allocation2] sm:$0xff] }
  0xad   : > { %v194_v28 = vmul.f32 0.00390625, %v190_v27 }
  0xae   : > { %200 = vst.msk [vmem:[%s144_s17 + $0x10] sm:$0xff] %vm149_vm0, %v196_v26 }
  0xaf   : > { %198 = vst.msk [vmem:[%s144_s17] sm:$0xff] %vm149_vm0, %v194_v28  ;;  %v193_v29 = vld [vmem:[#allocation2 + $0x18] sm:$0xff] }
  0xb0   : > { %v197_v30 = vmul.f32 0.00390625, %v193_v29  ;;  %v191_v31 = vld [vmem:[#allocation2 + $0x8] sm:$0xff] }
  0xb1   : > { %v195_v32 = vmul.f32 0.00390625, %v191_v31 }
  0xb2   : > { %201 = vst.msk [vmem:[%s144_s17 + $0x18] sm:$0xff] %vm149_vm0, %v197_v30 }
  0xb3   : > { %199 = vst.msk [vmem:[%s144_s17 + $0x8] sm:$0xff] %vm149_vm0, %v195_v32 }
  0xb4 PF: > { %s11_s8 = sadd.s32 1, %s331_s8   ;;  %s395_s6 = smov %s327_s7 }
  0xb5   : > { %p8_p5 = scmp.ge.s32.totalorder %s11_s8, 4   ;;  %s396_s7 = smov %s398_s9 }
  0xb7   :  { %10 = sbr.rel (!%p8_p5) target bundleno = 2 (0x2), region = 62 }

</bundles_post_ra>
